<compile_context>
chip_gen: v7x
topology: tpu7x:2x2x1
jax: 0.10.0
libtpu: 0.0.40
codegen_flags: <defaults>
</compile_context>

<pallas_src>
import jax
import jax.numpy as jnp
from jax.experimental import pallas as pl
from jax.experimental.pallas import tpu as pltpu


def _fc_loc_kernel(x_ref, w1_ref, b1_ref, w2_ref, b2_ref, o_ref):
    # x: (TB, indim), w1: (indim, H), b1: (1, H) f32, w2: (H, outdim), b2: (1, outdim) f32
    x = x_ref[...]
    h = jnp.dot(x, w1_ref[...], preferred_element_type=jnp.float32) + b1_ref[...]
    h = jnp.maximum(h, 0.0)                                     # ReLU(inplace=True)
    y = jnp.dot(h.astype(w2_ref.dtype), w2_ref[...],
                preferred_element_type=jnp.float32) + b2_ref[...]
    o_ref[...] = y.astype(o_ref.dtype)


def _round_up(x, m):
    return ((x + m - 1) // m) * m


def fc_loc(x, w1, b1, w2, b2, *, block_b=1024, compute_dtype=jnp.bfloat16):
    """Fused MLP: x (B, indim) -> (B, outdim).

    Weights are stored pre-transposed: w1 (indim, hidden), w2 (hidden, outdim).
    Matmuls run in `compute_dtype` with f32 accumulation; output is x.dtype.
    """
    B, indim = x.shape
    hidden, outdim = w2.shape
    out_dtype = x.dtype

    # ---- compute-dtype casts (halves x-read / weight DMA for bf16) ----------
    xc = x.astype(compute_dtype)
    w1c = w1.astype(compute_dtype)
    w2c = w2.astype(compute_dtype)
    b1r = b1.reshape(1, -1).astype(jnp.float32)
    b2r = b2.reshape(1, -1).astype(jnp.float32)

    # ---- batch tile sizing ---------------------------------------------------
    # >= 2 grid steps once B >= 16 so the "parallel" axis shards across v7x's
    # two TensorCores; otherwise a single 8-row-aligned tile.
    if B >= 16:
        tb_target = _round_up(pl.cdiv(B, 2), 8)
    else:
        tb_target = _round_up(B, 8)
    tb = min(block_b, tb_target)

    # ---- VMEM budget (chip-derived cap) --------------------------------------
    try:
        phys_vmem = int(pltpu.get_tpu_info().vmem_capacity_bytes)
    except Exception:
        phys_vmem = 64 << 20                      # conservative (v7x per-TC)
    vmem_cap = min(phys_vmem // 2, 48 << 20)      # ~32 MiB on v7x, 48 MiB on v5e/v6e

    cx = jnp.dtype(compute_dtype).itemsize
    co = jnp.dtype(out_dtype).itemsize

    def _tile_bytes(t):
        # double-buffered input + output tiles
        return 2 * t * indim * cx + 2 * t * outdim * co

    # Clamp tb so pipelined tiles stay well under half the scoped budget.
    while tb > 8 and _tile_bytes(tb) > vmem_cap // 2:
        tb = _round_up(tb // 2, 8)

    grid = (pl.cdiv(B, tb),)

    weight_bytes = 2 * ((indim * hidden + hidden * outdim) * cx
                        + (hidden + outdim) * 4)   # resident (double-buffered) weights+biases
    est = _tile_bytes(tb) + weight_bytes
    vmem_limit = int(min(max(2 * est, 4 << 20), vmem_cap))

    out = pl.pallas_call(
        _fc_loc_kernel,
        out_shape=jax.ShapeDtypeStruct((B, outdim), out_dtype),
        grid_spec=pltpu.PrefetchScalarGridSpec(
            num_scalar_prefetch=0,
            grid=grid,
            in_specs=[
                pl.BlockSpec((tb, indim), lambda i: (i, 0)),       # x: tiled over batch
                pl.BlockSpec((indim, hidden), lambda i: (0, 0)),   # w1: resident
                pl.BlockSpec((1, hidden), lambda i: (0, 0)),       # b1: resident (f32)
                pl.BlockSpec((hidden, outdim), lambda i: (0, 0)),  # w2: resident
                pl.BlockSpec((1, outdim), lambda i: (0, 0)),       # b2: resident (f32)
            ],
            out_specs=pl.BlockSpec((tb, outdim), lambda i: (i, 0)),
        ),
        compiler_params=pltpu.CompilerParams(
            dimension_semantics=("parallel",),     # batch tiles independent; v7x 2-TC shard
            vmem_limit_bytes=vmem_limit,
        ),
    )(xc, w1c, b1r, w2c, b2r)

    return out


def init_params(indim, hidden, outdim, key):
    """PyTorch-default Linear init (uniform(-1/sqrt(fan_in), +1/sqrt(fan_in))).

    Weights returned pre-transposed to (in, out) for the kernel.
    """
    k_w1, k_b1, k_w2, k_b2 = jax.random.split(key, 4)
    bound1 = 1.0 / jnp.sqrt(jnp.float32(indim))
    w1 = jax.random.uniform(k_w1, (indim, hidden), jnp.float32, -bound1, bound1)
    b1 = jax.random.uniform(k_b1, (1, hidden), jnp.float32, -bound1, bound1)
    bound2 = 1.0 / jnp.sqrt(jnp.float32(hidden))
    w2 = jax.random.uniform(k_w2, (hidden, outdim), jnp.float32, -bound2, bound2)
    b2 = jax.random.uniform(k_b2, (1, outdim), jnp.float32, -bound2, bound2)
    return w1, b1, w2, b2


if __name__ == "__main__":
    key = jax.random.PRNGKey(0)
    k_x, k_p = jax.random.split(key)

    B, INDIM, HIDDEN, OUTDIM = 8, 64, 32, 6
    x = jax.random.normal(k_x, (B, INDIM), jnp.float32)
    w1, b1, w2, b2 = init_params(INDIM, HIDDEN, OUTDIM, k_p)

    # Pure-JAX f32 reference.
    ref = jnp.maximum(x @ w1 + b1, 0.0) @ w2 + b2

    # Exact f32 path: tight tolerance.
    y32 = fc_loc(x, w1, b1, w2, b2, compute_dtype=jnp.float32)
    jax.block_until_ready(y32)
    assert y32.shape == (B, OUTDIM)
    assert y32.dtype == x.dtype
    assert jnp.allclose(y32, ref, atol=1e-4, rtol=1e-4)

    # Default bf16-compute path: loosened tolerance (bf16 mantissa).
    y = fc_loc(x, w1, b1, w2, b2)
    jax.block_until_ready(y)
    assert y.shape == (B, OUTDIM)
    assert y.dtype == x.dtype
    assert jnp.allclose(y, ref, atol=5e-2, rtol=5e-2)

    print("KERNEL_OK")
</pallas_src>

<mosaic_0001>
module attributes {stable_mosaic.version = 11 : i64} {
  func.func @_fc_loc_kernel(%arg0: i32, %arg1: memref<8x64xf32, #tpu.memory_space<vmem>>, %arg2: memref<64x32xf32, #tpu.memory_space<vmem>>, %arg3: memref<1x32xf32, #tpu.memory_space<vmem>>, %arg4: memref<32x6xf32, #tpu.memory_space<vmem>>, %arg5: memref<1x6xf32, #tpu.memory_space<vmem>>, %arg6: memref<8x6xf32, #tpu.memory_space<vmem>>) attributes {dimension_semantics = [#tpu.dimension_semantics<parallel>], iteration_bounds = array<i64: 1>, scalar_prefetch = 0 : i64, scratch_operands = 0 : i64, tpu.core_type = #tpu.core_type<tc>, window_params = [{transform_indices = @transform_0, window_bounds = array<i64: 8, 64>}, {pipeline_mode = #tpu.pipeline_mode<synchronous>, transform_indices = @transform_1, window_bounds = array<i64: 64, 32>}, {pipeline_mode = #tpu.pipeline_mode<synchronous>, transform_indices = @transform_2, window_bounds = array<i64: 1, 32>}, {pipeline_mode = #tpu.pipeline_mode<synchronous>, transform_indices = @transform_3, window_bounds = array<i64: 32, 6>}, {pipeline_mode = #tpu.pipeline_mode<synchronous>, transform_indices = @transform_4, window_bounds = array<i64: 1, 6>}, {transform_indices = @transform_5, window_bounds = array<i64: 8, 6>}]} {
    %c0 = arith.constant 0 : index
    %c0_0 = arith.constant 0 : index
    %0 = vector.load %arg1[%c0, %c0_0] : memref<8x64xf32, #tpu.memory_space<vmem>>, vector<8x64xf32>
    %c0_1 = arith.constant 0 : index
    %c0_2 = arith.constant 0 : index
    %1 = vector.load %arg2[%c0_1, %c0_2] : memref<64x32xf32, #tpu.memory_space<vmem>>, vector<64x32xf32>
    %cst = arith.constant dense<0.000000e+00> : vector<8x32xf32>
    %2 = tpu.matmul %0, %1, %cst {dimension_numbers = #tpu.dot_dimension_numbers<[1], [0], [0], [1], [0, 0, 1, 1], [], []>} : vector<8x64xf32>, vector<64x32xf32>, vector<8x32xf32> -> vector<8x32xf32>
    %c0_3 = arith.constant 0 : index
    %c0_4 = arith.constant 0 : index
    %3 = vector.load %arg3[%c0_3, %c0_4] : memref<1x32xf32, #tpu.memory_space<vmem>>, vector<1x32xf32>
    %4 = vector.broadcast %3 : vector<1x32xf32> to vector<8x32xf32>
    %5 = arith.addf %2, %4 : vector<8x32xf32>
    %cst_5 = arith.constant 0.000000e+00 : f32
    %6 = vector.broadcast %cst_5 : f32 to vector<8x32xf32>
    %7 = arith.maximumf %5, %6 : vector<8x32xf32>
    %c0_6 = arith.constant 0 : index
    %c0_7 = arith.constant 0 : index
    %8 = vector.load %arg4[%c0_6, %c0_7] : memref<32x6xf32, #tpu.memory_space<vmem>>, vector<32x6xf32>
    %cst_8 = arith.constant dense<0.000000e+00> : vector<8x6xf32>
    %9 = tpu.matmul %7, %8, %cst_8 {dimension_numbers = #tpu.dot_dimension_numbers<[1], [0], [0], [1], [0, 0, 1, 1], [], []>} : vector<8x32xf32>, vector<32x6xf32>, vector<8x6xf32> -> vector<8x6xf32>
    %c0_9 = arith.constant 0 : index
    %c0_10 = arith.constant 0 : index
    %10 = vector.load %arg5[%c0_9, %c0_10] : memref<1x6xf32, #tpu.memory_space<vmem>>, vector<1x6xf32>
    %11 = vector.broadcast %10 : vector<1x6xf32> to vector<8x6xf32>
    %12 = arith.addf %9, %11 : vector<8x6xf32>
    %c0_11 = arith.constant 0 : index
    %c0_12 = arith.constant 0 : index
    %13 = vector.load %arg6[%c0_11, %c0_12] : memref<8x6xf32, #tpu.memory_space<vmem>>, vector<8x6xf32>
    tpu.vector_store %arg6[%c0_11, %c0_12], %12 {strides = array<i32>} : memref<8x6xf32, #tpu.memory_space<vmem>>, vector<8x6xf32>,
    return
  }
  func.func @transform_0(%arg0: i32) -> (i32, i32) {
    %c0_i32 = arith.constant 0 : i32
    %c0_i32_0 = arith.constant 0 : i32
    return %arg0, %c0_i32 : i32, i32
  }
  func.func @transform_1(%arg0: i32) -> (i32, i32) {
    %c0_i32 = arith.constant 0 : i32
    %c0_i32_0 = arith.constant 0 : i32
    %c0_i32_1 = arith.constant 0 : i32
    return %c0_i32, %c0_i32_0 : i32, i32
  }
  func.func @transform_2(%arg0: i32) -> (i32, i32) {
    %c0_i32 = arith.constant 0 : i32
    %c0_i32_0 = arith.constant 0 : i32
    %c0_i32_1 = arith.constant 0 : i32
    return %c0_i32, %c0_i32_0 : i32, i32
  }
  func.func @transform_3(%arg0: i32) -> (i32, i32) {
    %c0_i32 = arith.constant 0 : i32
    %c0_i32_0 = arith.constant 0 : i32
    %c0_i32_1 = arith.constant 0 : i32
    return %c0_i32, %c0_i32_0 : i32, i32
  }
  func.func @transform_4(%arg0: i32) -> (i32, i32) {
    %c0_i32 = arith.constant 0 : i32
    %c0_i32_0 = arith.constant 0 : i32
    %c0_i32_1 = arith.constant 0 : i32
    return %c0_i32, %c0_i32_0 : i32, i32
  }
  func.func @transform_5(%arg0: i32) -> (i32, i32) {
    %c0_i32 = arith.constant 0 : i32
    %c0_i32_0 = arith.constant 0 : i32
    return %arg0, %c0_i32 : i32, i32
  }
}

</mosaic_0001>

<bundles_post_ra>
// kernel: tpu_custom_call.1
= control target key start
LH: loop header
LB: loop body
LE: loop exit
PB: predicated region body
PF: predicated region fallthrough
CT: control target
= control target key end

     0   :  { %v307_v3 = vmov 0.0|0.0   ;;  %vm308_vm0 = vmmov 0   ;;  %v309_v6 = vmov 0.0   ;;  %s398_s0 = inlined_call_operand.vmem [shape: f32[8,64], index: 0, kind: input, shape index: {}]   ;;  %s399_s1 = inlined_call_operand.vmem [shape: f32[64,32], index: 1, kind: input, shape index: {}]   ;;  %s400_s2 = inlined_call_operand.vmem [shape: f32[1,32], index: 2, kind: input, shape index: {}]   ;;  %s401_s3 = inlined_call_operand.vmem [shape: f32[32,6], index: 3, kind: input, shape index: {}]   ;;  %s402_s4 = inlined_call_operand.vmem [shape: f32[1,6], index: 4, kind: input, shape index: {}]   ;;  %s403_s5 = inlined_call_operand.hbm [shape: f32[8,6], index: 5, kind: output, shape index: {}]  }
   0x1   :  { %v22_v0 = vld [vmem:[%s399_s1] sm:$0xff]  ;;  %v23_v1 = vld [vmem:[%s399_s1 + $0x8] sm:$0xff]  ;;  %v24_v2 = vld [vmem:[%s399_s1 + $0x10] sm:$0xff]  ;;  %261 = vmatprep.subr.bf16.mxu0 %v307_v3  ;;  %247 = vmatprep.mubr.msk.f32.mxu0 %vm308_vm0, %v309_v6 }
   0x2   :  { %v262_v4 = vpack.c.bf16 %v23_v1, %v22_v0  ;;  %v25_v5 = vld [vmem:[%s399_s1 + $0x18] sm:$0xff]  ;;  %273 = vmatprep.subr.bf16.mxu1 %v307_v3  ;;  %258 = vmatprep.mubr.msk.f32.mxu1 %vm308_vm0, %v309_v6  ;;  %v112_v8 = vld [vmem:[%s401_s3] sm:$0xff]  ;;  %v113_v9 = vld [vmem:[%s401_s3 + $0x8] sm:$0xff] }
   0x3   :  { %v265_v7 = vpack.c.bf16 %v25_v5, %v24_v2  ;;  %v26_v10 = vld [vmem:[%s399_s1 + $0x20] sm:$0xff]  ;;  %v27_v11 = vld [vmem:[%s399_s1 + $0x28] sm:$0xff]  ;;  %v274_v12 = vpack.c.bf16 %v113_v9, %v112_v8 }
   0x4   :  { %263 = vmatpush3.bf16.msra.mxu0 %v262_v4 }
   0x5   :  { %264 = vmatprep.subr.bf16.mxu0 %v307_v3 }
   0x6   :  { %10 = vsyncpa [#allocation3], 0  ;;  %275 = vmatpush3.bf16.msra.mxu1 %v274_v12  ;;  %v268_v13 = vpack.c.bf16 %v27_v11, %v26_v10  ;;  %v28_v14 = vld [vmem:[%s399_s1 + $0x30] sm:$0xff]  ;;  %v29_v15 = vld [vmem:[%s399_s1 + $0x38] sm:$0xff]  ;;  %vm37_vm1 = vcmask 523264   ;;  %vm123_vm2 = vcmask 261120  }
   0x7   :  { %276 = vmatprep.subr.bf16.mxu1 %v307_v3  ;;  %v271_v16 = vpack.c.bf16 %v29_v15, %v28_v14  ;;  %v21_v17 = vld [vmem:[%s398_s0] sm:$0xff]  ;;  %v114_v18 = vld [vmem:[%s401_s3 + $0x10] sm:$0xff]  ;;  %v115_v19 = vld [vmem:[%s401_s3 + $0x18] sm:$0xff]  ;;  %s310_s21 = smov [#allocation2]   ;;  %vm197_vm3 = vcmask 48128  }
   0x8   :  { %266 = vmatpush3.bf16.msra.mxu0 %v265_v7  ;;  %v277_v20 = vpack.c.bf16 %v115_v19, %v114_v18  ;;  %v213_v21 = vld [vmem:[%s400_s2] ss:$0 sm:$0xff]  ;;  %s205_s22 = sshll.u32 %s310_s21, 4  ;;  %s206_s22 = int_to_ptr.vmem [resolvable:$true] %s205_s22 }
   0x9   :  { %267 = vmatprep.subr.bf16.mxu0 %v307_v3  ;;  %v215_v26 = vld [vmem:[%s402_s4] ss:$0 sm:$0xff]  ;;  %s283_s3 = scalar_lea.vmem %s206_s22, 128  ;;  %p288_p1 = scmp.lt.s32.totalorder %s206_s22, %s206_s22 }
   0xa   :  { %278 = vmatpush3.bf16.msra.mxu1 %v277_v20  ;;  %p284_p0 = scmp.ne.s32.totalorder %s206_s22, %s283_s3  ;;  %p289_p2 = scmp.lt.s32.totalorder %s283_s3, %s283_s3 }
   0xc   :  { %269 = vmatpush3.bf16.msra.mxu0 %v268_v13  ;;  %p290_p3 = por %p289_p2, %p288_p1 }
   0xd   :  { %270 = vmatprep.subr.bf16.mxu0 %v307_v3 }
   0xe   :  { %p291_p4 = pnand %p290_p3, %p284_p0 }
  0x10   :  { %272 = vmatpush3.bf16.msra.mxu0 %v271_v16 }
  0x13   :  { %248 = vmatmul.mubr.msk.f32.vlgmr.msra.gmra.mrb[0].mxu0 %vm37_vm1, %v21_v17 }
  0xe6   :  { %v107_v22 = vpop.f32.mrb[0].mxu0 }
  0xe7   :  { %v108_v23 = vadd.f32 %v213_v21, %v107_v22  ;;  %v249_v24 = vpop.f32.mrb[1].mxu0 }
  0xe9   :  { %v111_v25 = vmax.f32 %v108_v23, 0.0 }
  0xeb   :  { %259 = vmatmul.mubr.msk.f32.vlgmr.msra.gmra.mrb[0].mxu1 %vm123_vm2, %v111_v25 }
 0x1be   :  { %v193_v27 = vpop.f32.mrb[0].mxu1 }
 0x1bf   :  { %v194_v28 = vadd.f32 %v215_v26, %v193_v27  ;;  %v260_v29 = vpop.f32.mrb[1].mxu1 }
 0x1c1   :  { %198 = vst.msk [vmem:[#allocation2] sm:$0xff] %vm197_vm3, %v194_v28 }
 0x1c2   :  { %294 = shalt.err (!%p291_p4)
}
 0x1c3   :  { %s295_s24 = scalar_lea.hbm %s403_s5, 128 }
 0x1c4   :  { %p296_p5 = scmp.ne.s32.totalorder %s403_s5, %s295_s24  ;;  %p299_p6 = scmp.lt.u32.totalorder %s295_s24, %s403_s5 }
 0x1c6   :  { %p301_p7 = pnand %p299_p6, %p296_p5 }
 0x1c8   :  { %304 = shalt.err (!%p301_p7)
}
 0x1c9   :  { %208 = dma.vmem_to_hbm [thread:$0]  %s206_s22, 128, %s403_s5, [#allocation3]  }
 0x1ca   :  { %305 = dma.done.wait [#allocation3], 128  }
 0x1cb   :  { %306 = vsyncadd [#allocation3], 4294967168 }
 0x1cc   :  { %212 = vsyncpa [#allocation3], 1 }

</bundles_post_ra>
